<compile_context>
chip_gen: v5e
topology: v5e:2x2
jax: 0.10.0
libtpu: 0.0.40
codegen_flags: <defaults>
</compile_context>

<pallas_src>
import functools

import jax
import jax.numpy as jnp
from jax import lax
from jax.experimental import pallas as pl
from jax.experimental.pallas import tpu as pltpu

LANE = 128      # TPU vreg lane width
SUBLANE = 8     # TPU vreg sublane count (f32)
NEG_INF = -1e30


def _round_up(x, m):
    return (x + m - 1) // m * m


def _char_rnn_tile_kernel(z_in_ref, h0_ref, w_h_ref, logp_ref, h_out_ref,
                          *, h_pad, time_tile, t_real, t_pad, matmul_dtype):
    """One grid step == `time_tile` RNN timesteps.

    z_in_ref : (Tt, B_pad, HO_pad) f32  precomputed x@W_in + b (streamed in).
    h0_ref   : (B_pad, H_pad)      f32  initial hidden (fetched once).
    w_h_ref  : (H_pad, HO_pad)          recurrent weights (VMEM resident).
    logp_ref : (Tt, B_pad, O_pad)  f32  per-step log-probs (streamed out).
    h_out_ref: (B_pad, H_pad)      f32  hidden-state carry / final hidden.
    """
    g = pl.program_id(0)

    # Constant-index_map output block doubles as the hidden-state carry.
    @pl.when(g == 0)
    def _():
        h_out_ref[...] = h0_ref[...]

    guard_tail = (t_pad != t_real)   # static: only trace the select if T was padded

    def step(i, h):
        # Recurrent-path matmul is the only MXU work left on the serial chain.
        z = z_in_ref[i] + jnp.dot(h.astype(matmul_dtype), w_h_ref[...],
                                  preferred_element_type=jnp.float32)
        h_new = z[:, :h_pad]           # (B_pad, H_pad)   128-lane-aligned slice
        logits = z[:, h_pad:]          # (B_pad, O_pad)   padded lanes already -1e30

        # Numerically stable LogSoftmax(dim=1) in f32 (padded lanes exp() to 0).
        m = jnp.max(logits, axis=1, keepdims=True)
        shifted = logits - m
        lse = jnp.log(jnp.sum(jnp.exp(shifted), axis=1, keepdims=True))
        logp_ref[i] = (shifted - lse).astype(logp_ref.dtype)

        if guard_tail:
            t_global = g * time_tile + i
            h = jnp.where(t_global < t_real, h_new, h)
        else:
            h = h_new
        return h

    h_final = lax.fori_loop(0, time_tile, step, h_out_ref[...], unroll=True)
    h_out_ref[...] = h_final


def char_rnn_sequence(x_seq, h0, params, *, time_tile=8,
                      matmul_dtype=jnp.float32):
    """Run the CharRNN over a sequence in a single fused pallas_call.

    x_seq: (T, B, input_size), h0: (B, hidden_size)
    returns (log_probs (T, B, output_size), final hidden (B, hidden_size)).
    """
    wxh, whh, bh, wxo, who, bo = params
    T, B, I = x_seq.shape
    H = wxh.shape[1]
    O = wxo.shape[1]

    B_pad = _round_up(B, SUBLANE)
    I_pad = _round_up(I, LANE)
    H_pad = _round_up(H, LANE)
    O_pad = _round_up(O, LANE)
    HO_pad = H_pad + O_pad

    Tt = max(1, min(time_tile, T))
    T_pad = _round_up(T, Tt)
    n_tiles = T_pad // Tt

    f32 = jnp.float32
    w_itemsize = jnp.dtype(matmul_dtype).itemsize

    # ---- Pack padded, pre-transposed weights once on the wrapper side. -------
    # Columns [0, H_pad) -> hidden path, [H_pad, H_pad+O) -> logits,
    # [H_pad+O, HO_pad) -> padded logit lanes (masked via bias = -1e30).
    w_in = jnp.zeros((I_pad, HO_pad), f32)
    w_in = w_in.at[:I, :H].set(wxh.astype(f32)).at[:I, H_pad:H_pad + O].set(wxo.astype(f32))
    w_h = jnp.zeros((H_pad, HO_pad), f32)
    w_h = w_h.at[:H, :H].set(whh.astype(f32)).at[:H, H_pad:H_pad + O].set(who.astype(f32))
    b = jnp.zeros((1, HO_pad), f32)
    b = b.at[:, :H].set(bh.reshape(1, H).astype(f32))
    b = b.at[:, H_pad:H_pad + O].set(bo.reshape(1, O).astype(f32))
    b = b.at[:, H_pad + O:].set(NEG_INF)        # bake the logit-lane mask into bias

    x_p = jnp.zeros((T_pad, B_pad, I_pad), f32).at[:T, :B, :I].set(x_seq.astype(f32))
    h0_p = jnp.zeros((B_pad, H_pad), f32).at[:B, :H].set(h0.astype(f32))

    # ---- Hoisted input projection: one big time-parallel matmul (plain XLA). --
    x_mm = x_p.reshape(T_pad * B_pad, I_pad).astype(matmul_dtype)
    z_in = jnp.dot(x_mm, w_in.astype(matmul_dtype),
                   preferred_element_type=jnp.float32,
                   precision=jax.lax.Precision.HIGHEST)
    z_in = (z_in + b).reshape(T_pad, B_pad, HO_pad)          # f32, bias folded in

    w_h_k = w_h.astype(matmul_dtype)                          # VMEM-resident operand

    kernel = functools.partial(_char_rnn_tile_kernel, h_pad=H_pad, time_tile=Tt,
                               t_real=T, t_pad=T_pad, matmul_dtype=matmul_dtype)

    # Recurrent-path cost only (the input projection is XLA's problem now).
    flops = 2 * T_pad * B_pad * H_pad * HO_pad
    transcendentals = T_pad * B_pad * (O_pad + 1)
    bytes_accessed = (z_in.size * 4 + h0_p.size * 4 + w_h_k.size * w_itemsize
                      + T_pad * B_pad * O_pad * 4 + B_pad * H_pad * 4)

    # Explicit VMEM budget (double-buffered streamed blocks + resident weights).
    vmem_need = (2 * Tt * B_pad * HO_pad * 4        # z_in blocks
                 + 2 * Tt * B_pad * O_pad * 4       # logp blocks
                 + 2 * H_pad * HO_pad * w_itemsize  # W_h
                 + 4 * B_pad * H_pad * 4)           # h0 + h carry
    vmem_limit = int(min(max(2 * vmem_need, 32 * 1024 * 1024), 64 * 1024 * 1024))

    logp_p, h_p = pl.pallas_call(
        kernel,
        grid=(n_tiles,),
        in_specs=[
            pl.BlockSpec((Tt, B_pad, HO_pad), lambda g: (g, 0, 0)),  # z_in tile
            pl.BlockSpec((B_pad, H_pad), lambda g: (0, 0)),          # h0 (fetched once)
            pl.BlockSpec((H_pad, HO_pad), lambda g: (0, 0)),         # W_h (VMEM resident)
        ],
        out_specs=(
            pl.BlockSpec((Tt, B_pad, O_pad), lambda g: (g, 0, 0)),   # log-probs tile
            pl.BlockSpec((B_pad, H_pad), lambda g: (0, 0)),          # final hidden / carry
        ),
        out_shape=(
            jax.ShapeDtypeStruct((T_pad, B_pad, O_pad), f32),
            jax.ShapeDtypeStruct((B_pad, H_pad), f32),
        ),
        compiler_params=pltpu.CompilerParams(
            # Time axis carries the hidden state -> must stay sequential.
            dimension_semantics=("arbitrary",),
            vmem_limit_bytes=vmem_limit,
        ),
        cost_estimate=pl.CostEstimate(
            flops=flops,
            transcendentals=transcendentals,
            bytes_accessed=bytes_accessed,
        ),
    )(z_in, h0_p, w_h_k)

    return logp_p[:T, :B, :O], h_p[:B, :H]


def char_rnn_forward(x, h, params):
    """Single CharRNN step -- identical semantics to the PyTorch module forward."""
    logp_seq, h_new = char_rnn_sequence(x[None], h, params)
    return logp_seq[0], h_new


def init_params(key, input_size, hidden_size, output_size):
    """Deterministic init matching nn.Linear(in+hidden, ...) shapes.

    Weights are stored pre-transposed ([in, out]) and split along the input
    axis so concat((x, h), 1) @ W^T == x @ Wx + h @ Wh.
    """
    k1, k2, k3, k4 = jax.random.split(key, 4)
    fan_in = input_size + hidden_size
    bound = 1.0 / jnp.sqrt(fan_in)

    w_i2h = jax.random.uniform(k1, (fan_in, hidden_size), jnp.float32, -bound, bound)
    b_i2h = jax.random.uniform(k2, (1, hidden_size), jnp.float32, -bound, bound)
    w_i2o = jax.random.uniform(k3, (fan_in, output_size), jnp.float32, -bound, bound)
    b_i2o = jax.random.uniform(k4, (1, output_size), jnp.float32, -bound, bound)

    wxh = w_i2h[:input_size, :]     # (I, H)
    whh = w_i2h[input_size:, :]     # (H, H)
    wxo = w_i2o[:input_size, :]     # (I, O)
    who = w_i2o[input_size:, :]     # (H, O)
    return wxh, whh, b_i2h, wxo, who, b_i2o


def reference_forward(x, h, params):
    wxh, whh, bh, wxo, who, bo = params
    with jax.default_matmul_precision("highest"):
        h_new = x @ wxh + h @ whh + bh
        logits = x @ wxo + h @ who + bo
    logp = jax.nn.log_softmax(logits, axis=1)
    return logp, h_new


if __name__ == "__main__":
    input_size, hidden_size, output_size = 16, 32, 16
    batch, seq_len = 2, 8

    key = jax.random.PRNGKey(0)
    kp, kx = jax.random.split(key)
    params = init_params(kp, input_size, hidden_size, output_size)

    x_seq = jax.random.normal(kx, (seq_len, batch, input_size), jnp.float32)
    h0 = jnp.zeros((batch, hidden_size), jnp.float32)   # init_hidden()

    # Fused sequence kernel (one pallas_call for all timesteps).
    logp_seq, h_final = char_rnn_sequence(x_seq, h0, params)
    jax.block_until_ready((logp_seq, h_final))

    # Reference: unrolled per-step forward in plain JAX/XLA.
    ref_logps = []
    h_ref = h0
    for t in range(seq_len):
        lp, h_ref = reference_forward(x_seq[t], h_ref, params)
        ref_logps.append(lp)
    ref_logp_seq = jnp.stack(ref_logps)

    assert jnp.allclose(logp_seq, ref_logp_seq, atol=1e-4, rtol=1e-4), "logp mismatch"
    assert jnp.allclose(h_final, h_ref, atol=1e-4, rtol=1e-4), "hidden mismatch"

    # Single-step call matches the PyTorch module's forward(input, hidden).
    lp1, h1 = char_rnn_forward(x_seq[0], h0, params)
    ref_lp1, ref_h1 = reference_forward(x_seq[0], h0, params)
    assert jnp.allclose(lp1, ref_lp1, atol=1e-4, rtol=1e-4)
    assert jnp.allclose(h1, ref_h1, atol=1e-4, rtol=1e-4)

    print("KERNEL_OK")
</pallas_src>

<mosaic_0001>
module attributes {stable_mosaic.version = 11 : i64} {
  func.func @_char_rnn_tile_kernel(%arg0: i32, %arg1: memref<8x8x256xf32, #tpu.memory_space<vmem>>, %arg2: memref<8x128xf32, #tpu.memory_space<vmem>>, %arg3: memref<128x256xf32, #tpu.memory_space<vmem>>, %arg4: memref<8x8x128xf32, #tpu.memory_space<vmem>>, %arg5: memref<8x128xf32, #tpu.memory_space<vmem>>) attributes {dimension_semantics = [#tpu.dimension_semantics<arbitrary>], iteration_bounds = array<i64: 1>, scalar_prefetch = 0 : i64, scratch_operands = 0 : i64, tpu.core_type = #tpu.core_type<tc>, window_params = [{transform_indices = @transform_0, window_bounds = array<i64: 8, 8, 256>}, {pipeline_mode = #tpu.pipeline_mode<synchronous>, transform_indices = @transform_1, window_bounds = array<i64: 8, 128>}, {pipeline_mode = #tpu.pipeline_mode<synchronous>, transform_indices = @transform_2, window_bounds = array<i64: 128, 256>}, {transform_indices = @transform_3, window_bounds = array<i64: 8, 8, 128>}, {pipeline_mode = #tpu.pipeline_mode<synchronous>, transform_indices = @transform_4, window_bounds = array<i64: 8, 128>}]} {
    %c0_i32 = arith.constant 0 : i32
    %0 = arith.cmpi eq, %arg0, %c0_i32 : i32
    %1 = arith.extui %0 : i1 to i32
    %c0_i32_0 = arith.constant 0 : i32
    %2 = arith.cmpi ne, %1, %c0_i32_0 : i32
    scf.if %2 {
      %c0_76 = arith.constant 0 : index
      %c0_77 = arith.constant 0 : index
      %181 = vector.load %arg2[%c0_76, %c0_77] : memref<8x128xf32, #tpu.memory_space<vmem>>, vector<8x128xf32>
      %c0_78 = arith.constant 0 : index
      %c0_79 = arith.constant 0 : index
      %182 = vector.load %arg5[%c0_78, %c0_79] : memref<8x128xf32, #tpu.memory_space<vmem>>, vector<8x128xf32>
      tpu.vector_store %arg5[%c0_78, %c0_79], %181 {strides = array<i32>} : memref<8x128xf32, #tpu.memory_space<vmem>>, vector<8x128xf32>,
    } else {
    }
    %c0 = arith.constant 0 : index
    %c0_1 = arith.constant 0 : index
    %3 = vector.load %arg5[%c0, %c0_1] : memref<8x128xf32, #tpu.memory_space<vmem>>, vector<8x128xf32>
    %c0_i32_2 = arith.constant 0 : i32
    %4 = arith.index_cast %c0_i32_2 : i32 to index
    %c0_3 = arith.constant 0 : index
    %c0_4 = arith.constant 0 : index
    %5 = vector.load %arg1[%4, %c0_3, %c0_4] : memref<8x8x256xf32, #tpu.memory_space<vmem>>, vector<1x8x256xf32>
    %6 = vector.shape_cast %5 : vector<1x8x256xf32> to vector<8x256xf32>
    %c0_5 = arith.constant 0 : index
    %c0_6 = arith.constant 0 : index
    %7 = vector.load %arg3[%c0_5, %c0_6] : memref<128x256xf32, #tpu.memory_space<vmem>>, vector<128x256xf32>
    %cst = arith.constant dense<0.000000e+00> : vector<8x256xf32>
    %8 = tpu.matmul %3, %7, %cst {dimension_numbers = #tpu.dot_dimension_numbers<[1], [0], [0], [1], [0, 0, 1, 1], [], []>} : vector<8x128xf32>, vector<128x256xf32>, vector<8x256xf32> -> vector<8x256xf32>
    %9 = arith.addf %6, %8 : vector<8x256xf32>
    %10 = vector.extract_strided_slice %9 {offsets = [0, 0], sizes = [8, 128], strides = [1, 1]} : vector<8x256xf32> to vector<8x128xf32>
    %11 = vector.extract_strided_slice %9 {offsets = [0, 128], sizes = [8, 128], strides = [1, 1]} : vector<8x256xf32> to vector<8x128xf32>
    %cst_7 = arith.constant dense<0xFF800000> : vector<8xf32>
    %12 = vector.multi_reduction <maximumf>, %11, %cst_7 [1] : vector<8x128xf32> to vector<8xf32>
    %13 = vector.shape_cast %12 : vector<8xf32> to vector<8x1xf32>
    %14 = vector.broadcast %13 : vector<8x1xf32> to vector<8x128xf32>
    %15 = arith.subf %11, %14 : vector<8x128xf32>
    %16 = math.exp %15 : vector<8x128xf32>
    %cst_8 = arith.constant dense<0.000000e+00> : vector<8xf32>
    %17 = vector.multi_reduction <add>, %16, %cst_8 [1] : vector<8x128xf32> to vector<8xf32>
    %18 = vector.shape_cast %17 : vector<8xf32> to vector<8x1xf32>
    %19 = math.log %18 : vector<8x1xf32>
    %20 = vector.broadcast %19 : vector<8x1xf32> to vector<8x128xf32>
    %21 = arith.subf %15, %20 : vector<8x128xf32>
    %22 = arith.index_cast %c0_i32_2 : i32 to index
    %c0_9 = arith.constant 0 : index
    %c0_10 = arith.constant 0 : index
    %23 = vector.load %arg4[%22, %c0_9, %c0_10] : memref<8x8x128xf32, #tpu.memory_space<vmem>>, vector<1x8x128xf32>
    %24 = vector.shape_cast %23 : vector<1x8x128xf32> to vector<8x128xf32>
    %25 = vector.shape_cast %21 : vector<8x128xf32> to vector<1x8x128xf32>
    tpu.vector_store %arg4[%22, %c0_9, %c0_10], %25 {strides = array<i32>} : memref<8x8x128xf32, #tpu.memory_space<vmem>>, vector<1x8x128xf32>,
    %c1_i32 = arith.constant 1 : i32
    %26 = arith.index_cast %c1_i32 : i32 to index
    %c0_11 = arith.constant 0 : index
    %c0_12 = arith.constant 0 : index
    %27 = vector.load %arg1[%26, %c0_11, %c0_12] : memref<8x8x256xf32, #tpu.memory_space<vmem>>, vector<1x8x256xf32>
    %28 = vector.shape_cast %27 : vector<1x8x256xf32> to vector<8x256xf32>
    %c0_13 = arith.constant 0 : index
    %c0_14 = arith.constant 0 : index
    %29 = vector.load %arg3[%c0_13, %c0_14] : memref<128x256xf32, #tpu.memory_space<vmem>>, vector<128x256xf32>
    %cst_15 = arith.constant dense<0.000000e+00> : vector<8x256xf32>
    %30 = tpu.matmul %10, %29, %cst_15 {dimension_numbers = #tpu.dot_dimension_numbers<[1], [0], [0], [1], [0, 0, 1, 1], [], []>} : vector<8x128xf32>, vector<128x256xf32>, vector<8x256xf32> -> vector<8x256xf32>
    %31 = arith.addf %28, %30 : vector<8x256xf32>
    %32 = vector.extract_strided_slice %31 {offsets = [0, 0], sizes = [8, 128], strides = [1, 1]} : vector<8x256xf32> to vector<8x128xf32>
    %33 = vector.extract_strided_slice %31 {offsets = [0, 128], sizes = [8, 128], strides = [1, 1]} : vector<8x256xf32> to vector<8x128xf32>
    %cst_16 = arith.constant dense<0xFF800000> : vector<8xf32>
    %34 = vector.multi_reduction <maximumf>, %33, %cst_16 [1] : vector<8x128xf32> to vector<8xf32>
    %35 = vector.shape_cast %34 : vector<8xf32> to vector<8x1xf32>
    %36 = vector.broadcast %35 : vector<8x1xf32> to vector<8x128xf32>
    %37 = arith.subf %33, %36 : vector<8x128xf32>
    %38 = math.exp %37 : vector<8x128xf32>
    %cst_17 = arith.constant dense<0.000000e+00> : vector<8xf32>
    %39 = vector.multi_reduction <add>, %38, %cst_17 [1] : vector<8x128xf32> to vector<8xf32>
    %40 = vector.shape_cast %39 : vector<8xf32> to vector<8x1xf32>
    %41 = math.log %40 : vector<8x1xf32>
    %42 = vector.broadcast %41 : vector<8x1xf32> to vector<8x128xf32>
    %43 = arith.subf %37, %42 : vector<8x128xf32>
    %44 = arith.index_cast %c1_i32 : i32 to index
    %c0_18 = arith.constant 0 : index
    %c0_19 = arith.constant 0 : index
    %45 = vector.load %arg4[%44, %c0_18, %c0_19] : memref<8x8x128xf32, #tpu.memory_space<vmem>>, vector<1x8x128xf32>
    %46 = vector.shape_cast %45 : vector<1x8x128xf32> to vector<8x128xf32>
    %47 = vector.shape_cast %43 : vector<8x128xf32> to vector<1x8x128xf32>
    tpu.vector_store %arg4[%44, %c0_18, %c0_19], %47 {strides = array<i32>} : memref<8x8x128xf32, #tpu.memory_space<vmem>>, vector<1x8x128xf32>,
    %c2_i32 = arith.constant 2 : i32
    %48 = arith.index_cast %c2_i32 : i32 to index
    %c0_20 = arith.constant 0 : index
    %c0_21 = arith.constant 0 : index
    %49 = vector.load %arg1[%48, %c0_20, %c0_21] : memref<8x8x256xf32, #tpu.memory_space<vmem>>, vector<1x8x256xf32>
    %50 = vector.shape_cast %49 : vector<1x8x256xf32> to vector<8x256xf32>
    %c0_22 = arith.constant 0 : index
    %c0_23 = arith.constant 0 : index
    %51 = vector.load %arg3[%c0_22, %c0_23] : memref<128x256xf32, #tpu.memory_space<vmem>>, vector<128x256xf32>
    %cst_24 = arith.constant dense<0.000000e+00> : vector<8x256xf32>
    %52 = tpu.matmul %32, %51, %cst_24 {dimension_numbers = #tpu.dot_dimension_numbers<[1], [0], [0], [1], [0, 0, 1, 1], [], []>} : vector<8x128xf32>, vector<128x256xf32>, vector<8x256xf32> -> vector<8x256xf32>
    %53 = arith.addf %50, %52 : vector<8x256xf32>
    %54 = vector.extract_strided_slice %53 {offsets = [0, 0], sizes = [8, 128], strides = [1, 1]} : vector<8x256xf32> to vector<8x128xf32>
    %55 = vector.extract_strided_slice %53 {offsets = [0, 128], sizes = [8, 128], strides = [1, 1]} : vector<8x256xf32> to vector<8x128xf32>
    %cst_25 = arith.constant dense<0xFF800000> : vector<8xf32>
    %56 = vector.multi_reduction <maximumf>, %55, %cst_25 [1] : vector<8x128xf32> to vector<8xf32>
    %57 = vector.shape_cast %56 : vector<8xf32> to vector<8x1xf32>
    %58 = vector.broadcast %57 : vector<8x1xf32> to vector<8x128xf32>
    %59 = arith.subf %55, %58 : vector<8x128xf32>
    %60 = math.exp %59 : vector<8x128xf32>
    %cst_26 = arith.constant dense<0.000000e+00> : vector<8xf32>
    %61 = vector.multi_reduction <add>, %60, %cst_26 [1] : vector<8x128xf32> to vector<8xf32>
    %62 = vector.shape_cast %61 : vector<8xf32> to vector<8x1xf32>
    %63 = math.log %62 : vector<8x1xf32>
    %64 = vector.broadcast %63 : vector<8x1xf32> to vector<8x128xf32>
    %65 = arith.subf %59, %64 : vector<8x128xf32>
    %66 = arith.index_cast %c2_i32 : i32 to index
    %c0_27 = arith.constant 0 : index
    %c0_28 = arith.constant 0 : index
    %67 = vector.load %arg4[%66, %c0_27, %c0_28] : memref<8x8x128xf32, #tpu.memory_space<vmem>>, vector<1x8x128xf32>
    %68 = vector.shape_cast %67 : vector<1x8x128xf32> to vector<8x128xf32>
    %69 = vector.shape_cast %65 : vector<8x128xf32> to vector<1x8x128xf32>
    tpu.vector_store %arg4[%66, %c0_27, %c0_28], %69 {strides = array<i32>} : memref<8x8x128xf32, #tpu.memory_space<vmem>>, vector<1x8x128xf32>,
    %c3_i32 = arith.constant 3 : i32
    %70 = arith.index_cast %c3_i32 : i32 to index
    %c0_29 = arith.constant 0 : index
    %c0_30 = arith.constant 0 : index
    %71 = vector.load %arg1[%70, %c0_29, %c0_30] : memref<8x8x256xf32, #tpu.memory_space<vmem>>, vector<1x8x256xf32>
    %72 = vector.shape_cast %71 : vector<1x8x256xf32> to vector<8x256xf32>
    %c0_31 = arith.constant 0 : index
    %c0_32 = arith.constant 0 : index
    %73 = vector.load %arg3[%c0_31, %c0_32] : memref<128x256xf32, #tpu.memory_space<vmem>>, vector<128x256xf32>
    %cst_33 = arith.constant dense<0.000000e+00> : vector<8x256xf32>
    %74 = tpu.matmul %54, %73, %cst_33 {dimension_numbers = #tpu.dot_dimension_numbers<[1], [0], [0], [1], [0, 0, 1, 1], [], []>} : vector<8x128xf32>, vector<128x256xf32>, vector<8x256xf32> -> vector<8x256xf32>
    %75 = arith.addf %72, %74 : vector<8x256xf32>
    %76 = vector.extract_strided_slice %75 {offsets = [0, 0], sizes = [8, 128], strides = [1, 1]} : vector<8x256xf32> to vector<8x128xf32>
    %77 = vector.extract_strided_slice %75 {offsets = [0, 128], sizes = [8, 128], strides = [1, 1]} : vector<8x256xf32> to vector<8x128xf32>
    %cst_34 = arith.constant dense<0xFF800000> : vector<8xf32>
    %78 = vector.multi_reduction <maximumf>, %77, %cst_34 [1] : vector<8x128xf32> to vector<8xf32>
    %79 = vector.shape_cast %78 : vector<8xf32> to vector<8x1xf32>
    %80 = vector.broadcast %79 : vector<8x1xf32> to vector<8x128xf32>
    %81 = arith.subf %77, %80 : vector<8x128xf32>
    %82 = math.exp %81 : vector<8x128xf32>
    %cst_35 = arith.constant dense<0.000000e+00> : vector<8xf32>
    %83 = vector.multi_reduction <add>, %82, %cst_35 [1] : vector<8x128xf32> to vector<8xf32>
    %84 = vector.shape_cast %83 : vector<8xf32> to vector<8x1xf32>
    %85 = math.log %84 : vector<8x1xf32>
    %86 = vector.broadcast %85 : vector<8x1xf32> to vector<8x128xf32>
    %87 = arith.subf %81, %86 : vector<8x128xf32>
    %88 = arith.index_cast %c3_i32 : i32 to index
    %c0_36 = arith.constant 0 : index
    %c0_37 = arith.constant 0 : index
    %89 = vector.load %arg4[%88, %c0_36, %c0_37] : memref<8x8x128xf32, #tpu.memory_space<vmem>>, vector<1x8x128xf32>
    %90 = vector.shape_cast %89 : vector<1x8x128xf32> to vector<8x128xf32>
    %91 = vector.shape_cast %87 : vector<8x128xf32> to vector<1x8x128xf32>
    tpu.vector_store %arg4[%88, %c0_36, %c0_37], %91 {strides = array<i32>} : memref<8x8x128xf32, #tpu.memory_space<vmem>>, vector<1x8x128xf32>,
    %c4_i32 = arith.constant 4 : i32
    %92 = arith.index_cast %c4_i32 : i32 to index
    %c0_38 = arith.constant 0 : index
    %c0_39 = arith.constant 0 : index
    %93 = vector.load %arg1[%92, %c0_38, %c0_39] : memref<8x8x256xf32, #tpu.memory_space<vmem>>, vector<1x8x256xf32>
    %94 = vector.shape_cast %93 : vector<1x8x256xf32> to vector<8x256xf32>
    %c0_40 = arith.constant 0 : index
    %c0_41 = arith.constant 0 : index
    %95 = vector.load %arg3[%c0_40, %c0_41] : memref<128x256xf32, #tpu.memory_space<vmem>>, vector<128x256xf32>
    %cst_42 = arith.constant dense<0.000000e+00> : vector<8x256xf32>
    %96 = tpu.matmul %76, %95, %cst_42 {dimension_numbers = #tpu.dot_dimension_numbers<[1], [0], [0], [1], [0, 0, 1, 1], [], []>} : vector<8x128xf32>, vector<128x256xf32>, vector<8x256xf32> -> vector<8x256xf32>
    %97 = arith.addf %94, %96 : vector<8x256xf32>
    %98 = vector.extract_strided_slice %97 {offsets = [0, 0], sizes = [8, 128], strides = [1, 1]} : vector<8x256xf32> to vector<8x128xf32>
    %99 = vector.extract_strided_slice %97 {offsets = [0, 128], sizes = [8, 128], strides = [1, 1]} : vector<8x256xf32> to vector<8x128xf32>
    %cst_43 = arith.constant dense<0xFF800000> : vector<8xf32>
    %100 = vector.multi_reduction <maximumf>, %99, %cst_43 [1] : vector<8x128xf32> to vector<8xf32>
    %101 = vector.shape_cast %100 : vector<8xf32> to vector<8x1xf32>
    %102 = vector.broadcast %101 : vector<8x1xf32> to vector<8x128xf32>
    %103 = arith.subf %99, %102 : vector<8x128xf32>
    %104 = math.exp %103 : vector<8x128xf32>
    %cst_44 = arith.constant dense<0.000000e+00> : vector<8xf32>
    %105 = vector.multi_reduction <add>, %104, %cst_44 [1] : vector<8x128xf32> to vector<8xf32>
    %106 = vector.shape_cast %105 : vector<8xf32> to vector<8x1xf32>
    %107 = math.log %106 : vector<8x1xf32>
    %108 = vector.broadcast %107 : vector<8x1xf32> to vector<8x128xf32>
    %109 = arith.subf %103, %108 : vector<8x128xf32>
    %110 = arith.index_cast %c4_i32 : i32 to index
    %c0_45 = arith.constant 0 : index
    %c0_46 = arith.constant 0 : index
    %111 = vector.load %arg4[%110, %c0_45, %c0_46] : memref<8x8x128xf32, #tpu.memory_space<vmem>>, vector<1x8x128xf32>
    %112 = vector.shape_cast %111 : vector<1x8x128xf32> to vector<8x128xf32>
    %113 = vector.shape_cast %109 : vector<8x128xf32> to vector<1x8x128xf32>
    tpu.vector_store %arg4[%110, %c0_45, %c0_46], %113 {strides = array<i32>} : memref<8x8x128xf32, #tpu.memory_space<vmem>>, vector<1x8x128xf32>,
    %c5_i32 = arith.constant 5 : i32
    %114 = arith.index_cast %c5_i32 : i32 to index
    %c0_47 = arith.constant 0 : index
    %c0_48 = arith.constant 0 : index
    %115 = vector.load %arg1[%114, %c0_47, %c0_48] : memref<8x8x256xf32, #tpu.memory_space<vmem>>, vector<1x8x256xf32>
    %116 = vector.shape_cast %115 : vector<1x8x256xf32> to vector<8x256xf32>
    %c0_49 = arith.constant 0 : index
    %c0_50 = arith.constant 0 : index
    %117 = vector.load %arg3[%c0_49, %c0_50] : memref<128x256xf32, #tpu.memory_space<vmem>>, vector<128x256xf32>
    %cst_51 = arith.constant dense<0.000000e+00> : vector<8x256xf32>
    %118 = tpu.matmul %98, %117, %cst_51 {dimension_numbers = #tpu.dot_dimension_numbers<[1], [0], [0], [1], [0, 0, 1, 1], [], []>} : vector<8x128xf32>, vector<128x256xf32>, vector<8x256xf32> -> vector<8x256xf32>
    %119 = arith.addf %116, %118 : vector<8x256xf32>
    %120 = vector.extract_strided_slice %119 {offsets = [0, 0], sizes = [8, 128], strides = [1, 1]} : vector<8x256xf32> to vector<8x128xf32>
    %121 = vector.extract_strided_slice %119 {offsets = [0, 128], sizes = [8, 128], strides = [1, 1]} : vector<8x256xf32> to vector<8x128xf32>
    %cst_52 = arith.constant dense<0xFF800000> : vector<8xf32>
    %122 = vector.multi_reduction <maximumf>, %121, %cst_52 [1] : vector<8x128xf32> to vector<8xf32>
    %123 = vector.shape_cast %122 : vector<8xf32> to vector<8x1xf32>
    %124 = vector.broadcast %123 : vector<8x1xf32> to vector<8x128xf32>
    %125 = arith.subf %121, %124 : vector<8x128xf32>
    %126 = math.exp %125 : vector<8x128xf32>
    %cst_53 = arith.constant dense<0.000000e+00> : vector<8xf32>
    %127 = vector.multi_reduction <add>, %126, %cst_53 [1] : vector<8x128xf32> to vector<8xf32>
    %128 = vector.shape_cast %127 : vector<8xf32> to vector<8x1xf32>
    %129 = math.log %128 : vector<8x1xf32>
    %130 = vector.broadcast %129 : vector<8x1xf32> to vector<8x128xf32>
    %131 = arith.subf %125, %130 : vector<8x128xf32>
    %132 = arith.index_cast %c5_i32 : i32 to index
    %c0_54 = arith.constant 0 : index
    %c0_55 = arith.constant 0 : index
    %133 = vector.load %arg4[%132, %c0_54, %c0_55] : memref<8x8x128xf32, #tpu.memory_space<vmem>>, vector<1x8x128xf32>
    %134 = vector.shape_cast %133 : vector<1x8x128xf32> to vector<8x128xf32>
    %135 = vector.shape_cast %131 : vector<8x128xf32> to vector<1x8x128xf32>
    tpu.vector_store %arg4[%132, %c0_54, %c0_55], %135 {strides = array<i32>} : memref<8x8x128xf32, #tpu.memory_space<vmem>>, vector<1x8x128xf32>,
    %c6_i32 = arith.constant 6 : i32
    %136 = arith.index_cast %c6_i32 : i32 to index
    %c0_56 = arith.constant 0 : index
    %c0_57 = arith.constant 0 : index
    %137 = vector.load %arg1[%136, %c0_56, %c0_57] : memref<8x8x256xf32, #tpu.memory_space<vmem>>, vector<1x8x256xf32>
    %138 = vector.shape_cast %137 : vector<1x8x256xf32> to vector<8x256xf32>
    %c0_58 = arith.constant 0 : index
    %c0_59 = arith.constant 0 : index
    %139 = vector.load %arg3[%c0_58, %c0_59] : memref<128x256xf32, #tpu.memory_space<vmem>>, vector<128x256xf32>
    %cst_60 = arith.constant dense<0.000000e+00> : vector<8x256xf32>
    %140 = tpu.matmul %120, %139, %cst_60 {dimension_numbers = #tpu.dot_dimension_numbers<[1], [0], [0], [1], [0, 0, 1, 1], [], []>} : vector<8x128xf32>, vector<128x256xf32>, vector<8x256xf32> -> vector<8x256xf32>
    %141 = arith.addf %138, %140 : vector<8x256xf32>
    %142 = vector.extract_strided_slice %141 {offsets = [0, 0], sizes = [8, 128], strides = [1, 1]} : vector<8x256xf32> to vector<8x128xf32>
    %143 = vector.extract_strided_slice %141 {offsets = [0, 128], sizes = [8, 128], strides = [1, 1]} : vector<8x256xf32> to vector<8x128xf32>
    %cst_61 = arith.constant dense<0xFF800000> : vector<8xf32>
    %144 = vector.multi_reduction <maximumf>, %143, %cst_61 [1] : vector<8x128xf32> to vector<8xf32>
    %145 = vector.shape_cast %144 : vector<8xf32> to vector<8x1xf32>
    %146 = vector.broadcast %145 : vector<8x1xf32> to vector<8x128xf32>
    %147 = arith.subf %143, %146 : vector<8x128xf32>
    %148 = math.exp %147 : vector<8x128xf32>
    %cst_62 = arith.constant dense<0.000000e+00> : vector<8xf32>
    %149 = vector.multi_reduction <add>, %148, %cst_62 [1] : vector<8x128xf32> to vector<8xf32>
    %150 = vector.shape_cast %149 : vector<8xf32> to vector<8x1xf32>
    %151 = math.log %150 : vector<8x1xf32>
    %152 = vector.broadcast %151 : vector<8x1xf32> to vector<8x128xf32>
    %153 = arith.subf %147, %152 : vector<8x128xf32>
    %154 = arith.index_cast %c6_i32 : i32 to index
    %c0_63 = arith.constant 0 : index
    %c0_64 = arith.constant 0 : index
    %155 = vector.load %arg4[%154, %c0_63, %c0_64] : memref<8x8x128xf32, #tpu.memory_space<vmem>>, vector<1x8x128xf32>
    %156 = vector.shape_cast %155 : vector<1x8x128xf32> to vector<8x128xf32>
    %157 = vector.shape_cast %153 : vector<8x128xf32> to vector<1x8x128xf32>
    tpu.vector_store %arg4[%154, %c0_63, %c0_64], %157 {strides = array<i32>} : memref<8x8x128xf32, #tpu.memory_space<vmem>>, vector<1x8x128xf32>,
    %c7_i32 = arith.constant 7 : i32
    %158 = arith.index_cast %c7_i32 : i32 to index
    %c0_65 = arith.constant 0 : index
    %c0_66 = arith.constant 0 : index
    %159 = vector.load %arg1[%158, %c0_65, %c0_66] : memref<8x8x256xf32, #tpu.memory_space<vmem>>, vector<1x8x256xf32>
    %160 = vector.shape_cast %159 : vector<1x8x256xf32> to vector<8x256xf32>
    %c0_67 = arith.constant 0 : index
    %c0_68 = arith.constant 0 : index
    %161 = vector.load %arg3[%c0_67, %c0_68] : memref<128x256xf32, #tpu.memory_space<vmem>>, vector<128x256xf32>
    %cst_69 = arith.constant dense<0.000000e+00> : vector<8x256xf32>
    %162 = tpu.matmul %142, %161, %cst_69 {dimension_numbers = #tpu.dot_dimension_numbers<[1], [0], [0], [1], [0, 0, 1, 1], [], []>} : vector<8x128xf32>, vector<128x256xf32>, vector<8x256xf32> -> vector<8x256xf32>
    %163 = arith.addf %160, %162 : vector<8x256xf32>
    %164 = vector.extract_strided_slice %163 {offsets = [0, 0], sizes = [8, 128], strides = [1, 1]} : vector<8x256xf32> to vector<8x128xf32>
    %165 = vector.extract_strided_slice %163 {offsets = [0, 128], sizes = [8, 128], strides = [1, 1]} : vector<8x256xf32> to vector<8x128xf32>
    %cst_70 = arith.constant dense<0xFF800000> : vector<8xf32>
    %166 = vector.multi_reduction <maximumf>, %165, %cst_70 [1] : vector<8x128xf32> to vector<8xf32>
    %167 = vector.shape_cast %166 : vector<8xf32> to vector<8x1xf32>
    %168 = vector.broadcast %167 : vector<8x1xf32> to vector<8x128xf32>
    %169 = arith.subf %165, %168 : vector<8x128xf32>
    %170 = math.exp %169 : vector<8x128xf32>
    %cst_71 = arith.constant dense<0.000000e+00> : vector<8xf32>
    %171 = vector.multi_reduction <add>, %170, %cst_71 [1] : vector<8x128xf32> to vector<8xf32>
    %172 = vector.shape_cast %171 : vector<8xf32> to vector<8x1xf32>
    %173 = math.log %172 : vector<8x1xf32>
    %174 = vector.broadcast %173 : vector<8x1xf32> to vector<8x128xf32>
    %175 = arith.subf %169, %174 : vector<8x128xf32>
    %176 = arith.index_cast %c7_i32 : i32 to index
    %c0_72 = arith.constant 0 : index
    %c0_73 = arith.constant 0 : index
    %177 = vector.load %arg4[%176, %c0_72, %c0_73] : memref<8x8x128xf32, #tpu.memory_space<vmem>>, vector<1x8x128xf32>
    %178 = vector.shape_cast %177 : vector<1x8x128xf32> to vector<8x128xf32>
    %179 = vector.shape_cast %175 : vector<8x128xf32> to vector<1x8x128xf32>
    tpu.vector_store %arg4[%176, %c0_72, %c0_73], %179 {strides = array<i32>} : memref<8x8x128xf32, #tpu.memory_space<vmem>>, vector<1x8x128xf32>,
    %c8_i32 = arith.constant 8 : i32
    %c0_74 = arith.constant 0 : index
    %c0_75 = arith.constant 0 : index
    %180 = vector.load %arg5[%c0_74, %c0_75] : memref<8x128xf32, #tpu.memory_space<vmem>>, vector<8x128xf32>
    tpu.vector_store %arg5[%c0_74, %c0_75], %164 {strides = array<i32>} : memref<8x128xf32, #tpu.memory_space<vmem>>, vector<8x128xf32>,
    return
  }
  func.func @transform_0(%arg0: i32) -> (i32, i32, i32) {
    %c0_i32 = arith.constant 0 : i32
    %c0_i32_0 = arith.constant 0 : i32
    %c0_i32_1 = arith.constant 0 : i32
    return %arg0, %c0_i32, %c0_i32_0 : i32, i32, i32
  }
  func.func @transform_1(%arg0: i32) -> (i32, i32) {
    %c0_i32 = arith.constant 0 : i32
    %c0_i32_0 = arith.constant 0 : i32
    %c0_i32_1 = arith.constant 0 : i32
    return %c0_i32, %c0_i32_0 : i32, i32
  }
  func.func @transform_2(%arg0: i32) -> (i32, i32) {
    %c0_i32 = arith.constant 0 : i32
    %c0_i32_0 = arith.constant 0 : i32
    %c0_i32_1 = arith.constant 0 : i32
    return %c0_i32, %c0_i32_0 : i32, i32
  }
  func.func @transform_3(%arg0: i32) -> (i32, i32, i32) {
    %c0_i32 = arith.constant 0 : i32
    %c0_i32_0 = arith.constant 0 : i32
    %c0_i32_1 = arith.constant 0 : i32
    return %arg0, %c0_i32, %c0_i32_0 : i32, i32, i32
  }
  func.func @transform_4(%arg0: i32) -> (i32, i32) {
    %c0_i32 = arith.constant 0 : i32
    %c0_i32_0 = arith.constant 0 : i32
    %c0_i32_1 = arith.constant 0 : i32
    return %c0_i32, %c0_i32_0 : i32, i32
  }
}

</mosaic_0001>

<bundles_post_ra>
// kernel: tpu_custom_call.1
= control target key start
LH: loop header
LB: loop body
LE: loop exit
PB: predicated region body
PF: predicated region fallthrough
CT: control target
= control target key end

     0   :  { %10 = vsyncpa [#allocation3], 0  ;;  %s1370_s0 = inlined_call_operand.hbm [shape: f32[8,8,256], index: 0, kind: input, shape index: {}]   ;;  %s1371_s1 = inlined_call_operand.hbm [shape: f32[8,128], index: 1, kind: input, shape index: {}]   ;;  %s1372_s2 = inlined_call_operand.hbm [shape: f32[128,256], index: 2, kind: input, shape index: {}]   ;;  %s1373_s3 = inlined_call_operand.hbm [shape: f32[8,8,128], index: 3, kind: output, shape index: {0}]   ;;  %s1374_s4 = inlined_call_operand.hbm [shape: f32[8,128], index: 4, kind: output, shape index: {1}]  }
   0x1   :  { %11 = vsyncpa [#allocation6], 0 }
   0x2   :  { %12 = vsyncpa [#allocation4], 0  ;;  %s32_s17 = sshll.u32 %s1371_s1, 4  ;;  %s33_s17 = int_to_ptr.hbm [resolvable:$true] %s32_s17 }
   0x3   :  { %13 = vsyncpa [#allocation10], 0  ;;  %s986_s18 = smov [#allocation5]   ;;  %s18_s22 = sshll.u32 %s1370_s0, 4  ;;  %s19_s22 = int_to_ptr.hbm [resolvable:$true] %s18_s22 }
   0x4   :  { %s34_s19 = sshll.u32 %s986_s18, 4  ;;  %s987_s23 = smov [#allocation2]   ;;  %s35_s19 = int_to_ptr.vmem [resolvable:$true] %s34_s19 }
   0x5   :  { %37 = dma.hbm_to_vmem [thread:$0]  %s33_s17, 128, %s35_s19, [#allocation6]  }
   0x6   :  { %s20_s24 = sshll.u32 %s987_s23, 4  ;;  %s988_s25 = smov 256   ;;  %s21_s24 = int_to_ptr.vmem [resolvable:$true] %s20_s24 }
   0x7   :  { %s989_s26 = smov 16   ;;  %s42_s1 = sshll.u32 %s1372_s2, 4  ;;  %s43_s1 = int_to_ptr.hbm [resolvable:$true] %s42_s1 }
   0x8   :  { %26 = dma.hbm_to_vmem [thread:$0]  %s19_s22, 2048, %s21_s24, [#allocation3], %s988_s25, %s988_s25, %s989_s26  }
   0x9   :  { %s990_s29 = smov [#allocation7]  }
   0xa   :  { %s44_s30 = sshll.u32 %s990_s29, 4  ;;  %s45_s30 = int_to_ptr.vmem [resolvable:$true] %s44_s30 }
   0xb   :  { %50 = dma.hbm_to_vmem [thread:$0]  %s43_s1, 4096, %s45_s30, [#allocation6], %s988_s25, %s988_s25, %s989_s26  }
   0xc   :  { %978 = dma.done.wait [#allocation3], 2048  }
   0xd   :  { %979 = vsyncadd [#allocation3], 4294965248 }
   0xe   :  { %980 = dma.done.wait [#allocation6], 4224  }
   0xf   :  { %981 = vsyncadd [#allocation6], 4294963072  ;;  %v1029_v0 = vld [vmem:[#allocation7 + $0xf0] sm:$0xff]  ;;  %v1031_v1 = vld [vmem:[#allocation7 + $0xe0] sm:$0xff]  ;;  %s991_s0 = smov [#allocation9]   ;;  %s801_s7 = sshll.u32 %s1374_s4, 4  ;;  %s802_s7 = int_to_ptr.hbm [resolvable:$true] %s801_s7 }
  0x10   :  { %104 = vmatpush.msra.mxu0 %v1029_v0  ;;  %192 = vmatpush.msra.mxu2 %v1029_v0  ;;  %v1035_v2 = vld [vmem:[#allocation7 + $0xd0] sm:$0xff]  ;;  %v1039_v3 = vld [vmem:[#allocation7 + $0xc0] sm:$0xff]  ;;  %v1042_v4 = vld [vmem:[#allocation7 + $0xf8] sm:$0xff]  ;;  %s799_s2 = sshll.u32 %s991_s0, 4  ;;  %s992_s8 = smov [#allocation8]   ;;  %s800_s2 = int_to_ptr.vmem [resolvable:$true] %s799_s2 }
  0x11   :  { %v1045_v5 = vld [vmem:[#allocation7 + $0xb0] sm:$0xff]  ;;  %124 = vmatpush.msra.mxu1 %v1042_v4  ;;  %v1048_v6 = vld [vmem:[#allocation7 + $0xe8] sm:$0xff]  ;;  %212 = vmatpush.msra.mxu3 %v1042_v4  ;;  %v1052_v7 = vld [vmem:[#allocation7 + $0xd8] sm:$0xff]  ;;  %s785_s9 = sshll.u32 %s992_s8, 4  ;;  %s787_s4 = sshll.u32 %s1373_s3, 4  ;;  %s786_s9 = int_to_ptr.vmem [resolvable:$true] %s785_s9  ;;  %s788_s4 = int_to_ptr.hbm [resolvable:$true] %s787_s4 }
  0x12   :  { %105 = vmatpush.msra.mxu0 %v1031_v1  ;;  %193 = vmatpush.msra.mxu2 %v1031_v1  ;;  %v1055_v8 = vld [vmem:[#allocation7 + $0xa0] sm:$0xff]  ;;  %v1060_v9 = vld [vmem:[#allocation7 + $0xc8] sm:$0xff]  ;;  %v1063_v10 = vld [vmem:[#allocation7 + $0x90] sm:$0xff]  ;;  %s993_s12 = smov 128   ;;  %s994_s13 = smov 8  }
  0x13   :  { %125 = vmatpush.msra.mxu1 %v1048_v6  ;;  %213 = vmatpush.msra.mxu3 %v1048_v6  ;;  %v1068_v11 = vld [vmem:[#allocation7 + $0xb8] sm:$0xff]  ;;  %v1071_v12 = vld [vmem:[#allocation7 + $0x80] sm:$0xff]  ;;  %v1076_v13 = vld [vmem:[#allocation7 + $0xa8] sm:$0xff] }
  0x14   :  { %106 = vmatpush.msra.mxu0 %v1035_v2  ;;  %194 = vmatpush.msra.mxu2 %v1035_v2  ;;  %v1079_v14 = vld [vmem:[#allocation7 + $0x70] sm:$0xff]  ;;  %v1084_v15 = vld [vmem:[#allocation7 + $0x98] sm:$0xff]  ;;  %v1087_v16 = vld [vmem:[#allocation7 + $0x60] sm:$0xff] }
  0x15   :  { %126 = vmatpush.msra.mxu1 %v1052_v7  ;;  %214 = vmatpush.msra.mxu3 %v1052_v7  ;;  %v1092_v17 = vld [vmem:[#allocation7 + $0x88] sm:$0xff]  ;;  %v1095_v18 = vld [vmem:[#allocation7 + $0x50] sm:$0xff]  ;;  %v1100_v19 = vld [vmem:[#allocation7 + $0x78] sm:$0xff] }
  0x16   :  { %107 = vmatpush.msra.mxu0 %v1039_v3  ;;  %195 = vmatpush.msra.mxu2 %v1039_v3  ;;  %v1103_v20 = vld [vmem:[#allocation7 + $0x40] sm:$0xff]  ;;  %v1108_v21 = vld [vmem:[#allocation7 + $0x68] sm:$0xff]  ;;  %v1111_v22 = vld [vmem:[#allocation7 + $0x30] sm:$0xff] }
  0x17   :  { %127 = vmatpush.msra.mxu1 %v1060_v9  ;;  %215 = vmatpush.msra.mxu3 %v1060_v9  ;;  %v1116_v23 = vld [vmem:[#allocation7 + $0x58] sm:$0xff]  ;;  %v1119_v24 = vld [vmem:[#allocation7 + $0x20] sm:$0xff]  ;;  %v1124_v25 = vld [vmem:[#allocation7 + $0x48] sm:$0xff] }
  0x18   :  { %108 = vmatpush.msra.mxu0 %v1045_v5  ;;  %196 = vmatpush.msra.mxu2 %v1045_v5  ;;  %v1127_v26 = vld [vmem:[#allocation7 + $0x10] sm:$0xff]  ;;  %v1132_v27 = vld [vmem:[#allocation7 + $0x38] sm:$0xff]  ;;  %v1135_v28 = vld [vmem:[#allocation7] sm:$0xff] }
  0x19   :  { %128 = vmatpush.msra.mxu1 %v1068_v11  ;;  %216 = vmatpush.msra.mxu3 %v1068_v11  ;;  %v1140_v29 = vld [vmem:[#allocation5] sm:$0xff]  ;;  %v1142_v30 = vld [vmem:[#allocation7 + $0x28] sm:$0xff]  ;;  %v71_v36 = vld [vmem:[#allocation2 + $0x8] sm:$0xff] }
  0x1a   :  { %109 = vmatpush.msra.mxu0 %v1055_v8  ;;  %197 = vmatpush.msra.mxu2 %v1055_v8  ;;  %v1148_v31 = vld [vmem:[#allocation7 + $0x18] sm:$0xff]  ;;  %v1204_v32 = vld [vmem:[#allocation7 + $0x8] sm:$0xff]  ;;  %v159_v40 = vld [vmem:[#allocation2 + $0x18] sm:$0xff] }
  0x1b   :  { %129 = vmatpush.msra.mxu1 %v1076_v13  ;;  %217 = vmatpush.msra.mxu3 %v1076_v13  ;;  %v70_v33 = vld [vmem:[#allocation2] sm:$0xff]  ;;  %v158_v39 = vld [vmem:[#allocation2 + $0x10] sm:$0xff]  ;;  %v248_v46 = vld [vmem:[#allocation2 + $0x28] sm:$0xff] }
  0x1c   :  { %110 = vmatpush.msra.mxu0 %v1063_v10  ;;  %198 = vmatpush.msra.mxu2 %v1063_v10  ;;  %v247_v45 = vld [vmem:[#allocation2 + $0x20] sm:$0xff]  ;;  %v336_v51 = vld [vmem:[#allocation2 + $0x30] sm:$0xff]  ;;  %v337_v52 = vld [vmem:[#allocation2 + $0x38] sm:$0xff] }
  0x1d   :  { %130 = vmatpush.msra.mxu1 %v1084_v15  ;;  %218 = vmatpush.msra.mxu3 %v1084_v15  ;;  %v425_v57 = vld [vmem:[#allocation2 + $0x40] sm:$0xff]  ;;  %v426_v58 = vld [vmem:[#allocation2 + $0x48] sm:$0xff]  ;;  %v724_v63 = vld [vmem:[#allocation7 + $0xf0] sm:$0xff] }
  0x1e   :  { %111 = vmatpush.msra.mxu0 %v1071_v12  ;;  %199 = vmatpush.msra.mxu2 %v1071_v12 }
  0x1f   :  { %131 = vmatpush.msra.mxu1 %v1092_v17  ;;  %219 = vmatpush.msra.mxu3 %v1092_v17 }
  0x20   :  { %112 = vmatpush.msra.mxu0 %v1079_v14  ;;  %200 = vmatpush.msra.mxu2 %v1079_v14 }
  0x21   :  { %132 = vmatpush.msra.mxu1 %v1100_v19  ;;  %220 = vmatpush.msra.mxu3 %v1100_v19 }
  0x22   :  { %113 = vmatpush.msra.mxu0 %v1087_v16  ;;  %201 = vmatpush.msra.mxu2 %v1087_v16 }
  0x23   :  { %133 = vmatpush.msra.mxu1 %v1108_v21  ;;  %221 = vmatpush.msra.mxu3 %v1108_v21 }
  0x24   :  { %114 = vmatpush.msra.mxu0 %v1095_v18  ;;  %202 = vmatpush.msra.mxu2 %v1095_v18 }
  0x25   :  { %134 = vmatpush.msra.mxu1 %v1116_v23  ;;  %222 = vmatpush.msra.mxu3 %v1116_v23 }
  0x26   :  { %115 = vmatpush.msra.mxu0 %v1103_v20  ;;  %203 = vmatpush.msra.mxu2 %v1103_v20 }
  0x27   :  { %135 = vmatpush.msra.mxu1 %v1124_v25  ;;  %223 = vmatpush.msra.mxu3 %v1124_v25 }
  0x28   :  { %116 = vmatpush.msra.mxu0 %v1111_v22  ;;  %204 = vmatpush.msra.mxu2 %v1111_v22 }
  0x29   :  { %136 = vmatpush.msra.mxu1 %v1132_v27  ;;  %224 = vmatpush.msra.mxu3 %v1132_v27 }
  0x2a   :  { %117 = vmatpush.msra.mxu0 %v1119_v24  ;;  %205 = vmatpush.msra.mxu2 %v1119_v24 }
  0x2b   :  { %137 = vmatpush.msra.mxu1 %v1142_v30  ;;  %225 = vmatpush.msra.mxu3 %v1142_v30 }
  0x2c   :  { %118 = vmatpush.msra.mxu0 %v1127_v26  ;;  %206 = vmatpush.msra.mxu2 %v1127_v26 }
  0x2d   :  { %138 = vmatpush.msra.mxu1 %v1148_v31  ;;  %226 = vmatpush.msra.mxu3 %v1148_v31 }
  0x2e   :  { %119 = vmatpush.msra.mxu0 %v1135_v28  ;;  %207 = vmatpush.msra.mxu2 %v1135_v28 }
  0x2f   :  { %120 = vmatmul.f32.vlgmr.msra.gmra.mxu0 %v1140_v29  ;;  %139 = vmatpush.msra.mxu1 %v1204_v32 }
  0x30   :  { %281 = vmatpush.msrb.mxu0 %v1029_v0  ;;  %370 = vmatpush.msrb.mxu2 %v1029_v0 }
  0x31   :  { %227 = vmatpush.msra.mxu3 %v1204_v32  ;;  %140 = vmatmul.f32.vlgmr.msra.gmra.mxu1 %v1140_v29  ;;  %v694_v29 = vld [vmem:[#allocation7] sm:$0xff] }
  0x32   :  { %282 = vmatpush.msrb.mxu0 %v1031_v1  ;;  %371 = vmatpush.msrb.mxu2 %v1031_v1 }
  0x33   :  { %390 = vmatpush.msrb.mxu3 %v1042_v4  ;;  %301 = vmatpush.msrb.mxu1 %v1042_v4 }
  0x34   :  { %283 = vmatpush.msrb.mxu0 %v1035_v2  ;;  %372 = vmatpush.msrb.mxu2 %v1035_v2 }
  0x35   :  { %391 = vmatpush.msrb.mxu3 %v1048_v6  ;;  %302 = vmatpush.msrb.mxu1 %v1048_v6 }
  0x36   :  { %284 = vmatpush.msrb.mxu0 %v1039_v3  ;;  %373 = vmatpush.msrb.mxu2 %v1039_v3 }
  0x37   :  { %392 = vmatpush.msrb.mxu3 %v1052_v7  ;;  %303 = vmatpush.msrb.mxu1 %v1052_v7 }
  0x38   :  { %285 = vmatpush.msrb.mxu0 %v1045_v5  ;;  %374 = vmatpush.msrb.mxu2 %v1045_v5 }
  0x39   :  { %393 = vmatpush.msrb.mxu3 %v1060_v9  ;;  %304 = vmatpush.msrb.mxu1 %v1060_v9 }
  0x3a   :  { %286 = vmatpush.msrb.mxu0 %v1055_v8  ;;  %375 = vmatpush.msrb.mxu2 %v1055_v8 }
  0x3b   :  { %394 = vmatpush.msrb.mxu3 %v1068_v11  ;;  %305 = vmatpush.msrb.mxu1 %v1068_v11 }
  0x3c   :  { %287 = vmatpush.msrb.mxu0 %v1063_v10  ;;  %376 = vmatpush.msrb.mxu2 %v1063_v10 }
  0x3d   :  { %395 = vmatpush.msrb.mxu3 %v1076_v13  ;;  %306 = vmatpush.msrb.mxu1 %v1076_v13 }
  0x3e   :  { %288 = vmatpush.msrb.mxu0 %v1071_v12  ;;  %377 = vmatpush.msrb.mxu2 %v1071_v12 }
  0x3f   :  { %396 = vmatpush.msrb.mxu3 %v1084_v15  ;;  %307 = vmatpush.msrb.mxu1 %v1084_v15 }
  0x40   :  { %289 = vmatpush.msrb.mxu0 %v1079_v14  ;;  %378 = vmatpush.msrb.mxu2 %v1079_v14 }
  0x41   :  { %397 = vmatpush.msrb.mxu3 %v1092_v17  ;;  %308 = vmatpush.msrb.mxu1 %v1092_v17 }
  0x42   :  { %290 = vmatpush.msrb.mxu0 %v1087_v16  ;;  %379 = vmatpush.msrb.mxu2 %v1087_v16 }
  0x43   :  { %398 = vmatpush.msrb.mxu3 %v1100_v19  ;;  %309 = vmatpush.msrb.mxu1 %v1100_v19 }
  0x44   :  { %291 = vmatpush.msrb.mxu0 %v1095_v18  ;;  %380 = vmatpush.msrb.mxu2 %v1095_v18 }
  0x45   :  { %399 = vmatpush.msrb.mxu3 %v1108_v21  ;;  %310 = vmatpush.msrb.mxu1 %v1108_v21 }
  0x46   :  { %292 = vmatpush.msrb.mxu0 %v1103_v20  ;;  %381 = vmatpush.msrb.mxu2 %v1103_v20 }
  0x47   :  { %400 = vmatpush.msrb.mxu3 %v1116_v23  ;;  %311 = vmatpush.msrb.mxu1 %v1116_v23 }
  0x48   :  { %293 = vmatpush.msrb.mxu0 %v1111_v22  ;;  %382 = vmatpush.msrb.mxu2 %v1111_v22 }
  0x49   :  { %401 = vmatpush.msrb.mxu3 %v1124_v25  ;;  %312 = vmatpush.msrb.mxu1 %v1124_v25 }
  0x4a   :  { %294 = vmatpush.msrb.mxu0 %v1119_v24  ;;  %383 = vmatpush.msrb.mxu2 %v1119_v24 }
  0x4b   :  { %402 = vmatpush.msrb.mxu3 %v1132_v27  ;;  %313 = vmatpush.msrb.mxu1 %v1132_v27 }
  0x4c   :  { %295 = vmatpush.msrb.mxu0 %v1127_v26  ;;  %384 = vmatpush.msrb.mxu2 %v1127_v26 }
  0x4d   :  { %403 = vmatpush.msrb.mxu3 %v1142_v30  ;;  %314 = vmatpush.msrb.mxu1 %v1142_v30 }
  0x4e   :  { %296 = vmatpush.msrb.mxu0 %v1135_v28  ;;  %385 = vmatpush.msrb.mxu2 %v1135_v28 }
  0x4f   :  { %404 = vmatpush.msrb.mxu3 %v1148_v31  ;;  %315 = vmatpush.msrb.mxu1 %v1148_v31 }
  0x50   :  { %459 = vmatpush.msra.mxu0 %v1029_v0 }
  0x51   :  { %405 = vmatpush.msrb.mxu3 %v1204_v32  ;;  %316 = vmatpush.msrb.mxu1 %v1204_v32 }
  0x52   :  { %460 = vmatpush.msra.mxu0 %v1031_v1 }
  0x53   :  { %479 = vmatpush.msra.mxu1 %v1042_v4 }
  0x54   :  { %461 = vmatpush.msra.mxu0 %v1035_v2 }
  0x55   :  { %480 = vmatpush.msra.mxu1 %v1048_v6 }
  0x56   :  { %462 = vmatpush.msra.mxu0 %v1039_v3 }
  0x57   :  { %481 = vmatpush.msra.mxu1 %v1052_v7 }
  0x58   :  { %463 = vmatpush.msra.mxu0 %v1045_v5 }
  0x59   :  { %482 = vmatpush.msra.mxu1 %v1060_v9 }
  0x5a   :  { %464 = vmatpush.msra.mxu0 %v1055_v8 }
  0x5b   :  { %483 = vmatpush.msra.mxu1 %v1068_v11 }
  0x5c   :  { %465 = vmatpush.msra.mxu0 %v1063_v10 }
  0x5d   :  { %484 = vmatpush.msra.mxu1 %v1076_v13 }
  0x5e   :  { %466 = vmatpush.msra.mxu0 %v1071_v12 }
  0x5f   :  { %485 = vmatpush.msra.mxu1 %v1084_v15 }
  0x60   :  { %467 = vmatpush.msra.mxu0 %v1079_v14 }
  0x61   :  { %486 = vmatpush.msra.mxu1 %v1092_v17 }
  0x62   :  { %468 = vmatpush.msra.mxu0 %v1087_v16 }
  0x63   :  { %487 = vmatpush.msra.mxu1 %v1100_v19 }
  0x64   :  { %469 = vmatpush.msra.mxu0 %v1095_v18 }
  0x65   :  { %488 = vmatpush.msra.mxu1 %v1108_v21 }
  0x66   :  { %470 = vmatpush.msra.mxu0 %v1103_v20 }
  0x67   :  { %489 = vmatpush.msra.mxu1 %v1116_v23 }
  0x68   :  { %471 = vmatpush.msra.mxu0 %v1111_v22 }
  0x69   :  { %490 = vmatpush.msra.mxu1 %v1124_v25 }
  0x6a   :  { %472 = vmatpush.msra.mxu0 %v1119_v24 }
  0x6b   :  { %491 = vmatpush.msra.mxu1 %v1132_v27 }
  0x6c   :  { %473 = vmatpush.msra.mxu0 %v1127_v26 }
  0x6d   :  { %492 = vmatpush.msra.mxu1 %v1142_v30 }
  0x6e   :  { %474 = vmatpush.msra.mxu0 %v1135_v28 }
  0x6f   :  { %493 = vmatpush.msra.mxu1 %v1148_v31 }
  0x71   :  { %494 = vmatpush.msra.mxu1 %v1204_v32 }
  0xac   :  { %v121_v34 = vpop.f32.mrf.mxu0 }
  0xad   :  { %v144_v35 = vadd.f32 %v121_v34, %v70_v33 }
  0xae   :  { %v141_v37 = vpop.f32.mrf.mxu1 }
  0xaf   :  { %208 = vmatmul.f32.vlgmr.msra.gmra.mxu2 %v144_v35  ;;  %228 = vmatmul.f32.vlgmr.msra.gmra.mxu3 %v144_v35  ;;  %v1289_v38 = vadd.f32 %v141_v37, %v71_v36  ;;  %v603_v35 = vld [vmem:[#allocation2 + $0x60] sm:$0xff]  ;;  %v604_v36 = vld [vmem:[#allocation2 + $0x68] sm:$0xff] }
  0xb0   :  { %548 = vmatpush.msra.mxu2 %v1029_v0  ;;  %568 = vmatpush.msra.mxu3 %v1042_v4 }
  0xb1   :  { %146 = vmax.xlane.f32.xlu0 %v1289_v38 }
  0xb2   :  { %549 = vmatpush.msra.mxu2 %v1031_v1  ;;  %569 = vmatpush.msra.mxu3 %v1048_v6 }
  0xb4   :  { %550 = vmatpush.msra.mxu2 %v1035_v2  ;;  %570 = vmatpush.msra.mxu3 %v1052_v7 }
  0xb6   :  { %551 = vmatpush.msra.mxu2 %v1039_v3  ;;  %571 = vmatpush.msra.mxu3 %v1060_v9 }
  0xb8   :  { %552 = vmatpush.msra.mxu2 %v1045_v5  ;;  %572 = vmatpush.msra.mxu3 %v1068_v11 }
  0xba   :  { %553 = vmatpush.msra.mxu2 %v1055_v8  ;;  %573 = vmatpush.msra.mxu3 %v1076_v13 }
  0xbc   :  { %554 = vmatpush.msra.mxu2 %v1063_v10  ;;  %574 = vmatpush.msra.mxu3 %v1084_v15 }
  0xbe   :  { %555 = vmatpush.msra.mxu2 %v1071_v12  ;;  %575 = vmatpush.msra.mxu3 %v1092_v17 }
  0xc0   :  { %556 = vmatpush.msra.mxu2 %v1079_v14  ;;  %576 = vmatpush.msra.mxu3 %v1100_v19 }
  0xc2   :  { %557 = vmatpush.msra.mxu2 %v1087_v16  ;;  %577 = vmatpush.msra.mxu3 %v1108_v21 }
  0xc4   :  { %558 = vmatpush.msra.mxu2 %v1095_v18  ;;  %578 = vmatpush.msra.mxu3 %v1116_v23 }
  0xc6   :  { %559 = vmatpush.msra.mxu2 %v1103_v20  ;;  %579 = vmatpush.msra.mxu3 %v1124_v25 }
  0xc8   :  { %560 = vmatpush.msra.mxu2 %v1111_v22  ;;  %580 = vmatpush.msra.mxu3 %v1132_v27 }
  0xca   :  { %561 = vmatpush.msra.mxu2 %v1119_v24  ;;  %581 = vmatpush.msra.mxu3 %v1142_v30 }
  0xcc   :  { %562 = vmatpush.msra.mxu2 %v1127_v26  ;;  %582 = vmatpush.msra.mxu3 %v1148_v31 }
  0xce   :  { %563 = vmatpush.msra.mxu2 %v1135_v28  ;;  %583 = vmatpush.msra.mxu3 %v1204_v32 }
 0x132   :  { %v209_v41 = vpop.f32.mrf.mxu2  ;;  %v229_v42 = vpop.f32.mrf.mxu3 }
 0x133   :  { %v232_v43 = vadd.f32 %v209_v41, %v158_v39  ;;  %v1292_v44 = vadd.f32 %v229_v42, %v159_v40 }
 0x135   :  { %234 = vmax.xlane.f32.xlu0 %v1292_v44  ;;  %297 = vmatmul.f32.vlgmr.msrb.gmra.mxu0 %v232_v43 }
 0x136   :  { %317 = vmatmul.f32.vlgmr.msrb.gmra.mxu1 %v232_v43  ;;  %637 = vmatpush.msrb.mxu0 %v1029_v0  ;;  %v722_v0 = vld [vmem:[#allocation7 + $0xe0] sm:$0xff] }
 0x137   :  { %657 = vmatpush.msrb.mxu1 %v1042_v4 }
 0x138   :  { %638 = vmatpush.msrb.mxu0 %v1031_v1  ;;  %v720_v1 = vld [vmem:[#allocation7 + $0xd0] sm:$0xff] }
 0x139   :  { %658 = vmatpush.msrb.mxu1 %v1048_v6 }
 0x13a   :  { %639 = vmatpush.msrb.mxu0 %v1035_v2  ;;  %v718_v2 = vld [vmem:[#allocation7 + $0xc0] sm:$0xff] }
 0x13b   :  { %659 = vmatpush.msrb.mxu1 %v1052_v7 }
 0x13c   :  { %640 = vmatpush.msrb.mxu0 %v1039_v3  ;;  %v147_v3 = vpop.xlane.xlu0 %146 }
 0x13d   :  { %660 = vmatpush.msrb.mxu1 %v1060_v9 }
 0x13e   :  { %641 = vmatpush.msrb.mxu0 %v1045_v5  ;;  %v716_v5 = vld [vmem:[#allocation7 + $0xb0] sm:$0xff] }
 0x13f   :  { %661 = vmatpush.msrb.mxu1 %v1068_v11 }
 0x140   :  { %642 = vmatpush.msrb.mxu0 %v1055_v8  ;;  %v712_v8 = vld [vmem:[#allocation7 + $0x90] sm:$0xff] }
 0x141   :  { %662 = vmatpush.msrb.mxu1 %v1076_v13 }
 0x142   :  { %643 = vmatpush.msrb.mxu0 %v1063_v10  ;;  %v514_v10 = vld [vmem:[#allocation2 + $0x50] sm:$0xff] }
 0x143   :  { %663 = vmatpush.msrb.mxu1 %v1084_v15 }
 0x144   :  { %644 = vmatpush.msrb.mxu0 %v1071_v12  ;;  %v710_v12 = vld [vmem:[#allocation7 + $0x80] sm:$0xff] }
 0x145   :  { %664 = vmatpush.msrb.mxu1 %v1092_v17 }
 0x146   :  { %645 = vmatpush.msrb.mxu0 %v1079_v14 }
 0x147   :  { %665 = vmatpush.msrb.mxu1 %v1100_v19 }
 0x148   :  { %646 = vmatpush.msrb.mxu0 %v1087_v16 }
 0x149   :  { %666 = vmatpush.msrb.mxu1 %v1108_v21 }
 0x14a   :  { %647 = vmatpush.msrb.mxu0 %v1095_v18  ;;  %v708_v18 = vld [vmem:[#allocation7 + $0x70] sm:$0xff] }
 0x14b   :  { %667 = vmatpush.msrb.mxu1 %v1116_v23 }
 0x14c   :  { %648 = vmatpush.msrb.mxu0 %v1103_v20 }
 0x14d   :  { %668 = vmatpush.msrb.mxu1 %v1124_v25 }
 0x14e   :  { %649 = vmatpush.msrb.mxu0 %v1111_v22 }
 0x14f   :  { %669 = vmatpush.msrb.mxu1 %v1132_v27 }
 0x150   :  { %650 = vmatpush.msrb.mxu0 %v1119_v24  ;;  %v704_v24 = vld [vmem:[#allocation7 + $0x50] sm:$0xff] }
 0x151   :  { %670 = vmatpush.msrb.mxu1 %v1142_v30 }
 0x152   :  { %651 = vmatpush.msrb.mxu0 %v1127_v26  ;;  %v700_v26 = vld [vmem:[#allocation7 + $0x30] sm:$0xff] }
 0x153   :  { %671 = vmatpush.msrb.mxu1 %v1148_v31 }
 0x154   :  { %652 = vmatpush.msrb.mxu0 %v1135_v28  ;;  %v696_v28 = vld [vmem:[#allocation7 + $0x10] sm:$0xff] }
 0x155   :  { %672 = vmatpush.msrb.mxu1 %v1204_v32 }
 0x1b2   :  { %v298_v47 = vpop.f32.mrf.mxu0 }
 0x1b3   :  { %v321_v48 = vadd.f32 %v298_v47, %v247_v45  ;;  %v318_v49 = vpop.f32.mrf.mxu1 }
 0x1b4   :  { %v1327_v50 = vadd.f32 %v318_v49, %v248_v46 }
 0x1b5   :  { %386 = vmatmul.f32.vlgmr.msrb.gmra.mxu2 %v321_v48  ;;  %406 = vmatmul.f32.vlgmr.msrb.gmra.mxu3 %v321_v48 }
 0x1b6   :  { %323 = vmax.xlane.f32.xlu1 %v1327_v50  ;;  %746 = vmatpush.msrb.mxu3 %v1042_v4 }
 0x1b7   :  { %726 = vmatpush.msrb.mxu2 %v724_v63 }
 0x1b8   :  { %747 = vmatpush.msrb.mxu3 %v1048_v6  ;;  %v1352_v6 = vsub.f32 %v1289_v38, %v147_v3 }
 0x1b9   :  { %727 = vmatpush.msrb.mxu2 %v722_v0 }
 0x1ba   :  { %748 = vmatpush.msrb.mxu3 %v1052_v7  ;;  %v714_v7 = vld [vmem:[#allocation7 + $0xa0] sm:$0xff] }
 0x1bb   :  { %728 = vmatpush.msrb.mxu2 %v720_v1 }
 0x1bc   :  { %749 = vmatpush.msrb.mxu3 %v1060_v9  ;;  %v149_v9 = vmul.f32 1.442695, %v1352_v6 }
 0x1bd   :  { %729 = vmatpush.msrb.mxu2 %v718_v2 }
 0x1be   :  { %750 = vmatpush.msrb.mxu3 %v1068_v11  ;;  %v515_v11 = vld [vmem:[#allocation2 + $0x58] sm:$0xff]  ;;  %826 = vpow2.f32 %v149_v9 }
 0x1bf   :  { %730 = vmatpush.msrb.mxu2 %v716_v5 }
 0x1c0   :  { %751 = vmatpush.msrb.mxu3 %v1076_v13 }
 0x1c1   :  { %731 = vmatpush.msrb.mxu2 %v714_v7 }
 0x1c2   :  { %752 = vmatpush.msrb.mxu3 %v1084_v15 }
 0x1c3   :  { %732 = vmatpush.msrb.mxu2 %v712_v8 }
 0x1c4   :  { %753 = vmatpush.msrb.mxu3 %v1092_v17 }
 0x1c5   :  { %733 = vmatpush.msrb.mxu2 %v710_v12 }
 0x1c6   :  { %754 = vmatpush.msrb.mxu3 %v1100_v19  ;;  %v706_v19 = vld [vmem:[#allocation7 + $0x60] sm:$0xff] }
 0x1c7   :  { %734 = vmatpush.msrb.mxu2 %v708_v18 }
 0x1c8   :  { %755 = vmatpush.msrb.mxu3 %v1108_v21  ;;  %v827_v21 = vpop.eup %826 }
 0x1c9   :  { %735 = vmatpush.msrb.mxu2 %v706_v19 }
 0x1ca   :  { %756 = vmatpush.msrb.mxu3 %v1116_v23 }
 0x1cb   :  { %736 = vmatpush.msrb.mxu2 %v704_v24 }
 0x1cc   :  { %757 = vmatpush.msrb.mxu3 %v1124_v25  ;;  %v702_v25 = vld [vmem:[#allocation7 + $0x40] sm:$0xff] }
 0x1cd   :  { %737 = vmatpush.msrb.mxu2 %v702_v25 }
 0x1ce   :  { %758 = vmatpush.msrb.mxu3 %v1132_v27  ;;  %v698_v27 = vld [vmem:[#allocation7 + $0x20] sm:$0xff] }
 0x1cf   :  { %738 = vmatpush.msrb.mxu2 %v700_v26 }
 0x1d0   :  { %759 = vmatpush.msrb.mxu3 %v1142_v30 }
 0x1d1   :  { %739 = vmatpush.msrb.mxu2 %v698_v27 }
 0x1d2   :  { %760 = vmatpush.msrb.mxu3 %v1148_v31 }
 0x1d3   :  { %740 = vmatpush.msrb.mxu2 %v696_v28 }
 0x1d4   :  { %761 = vmatpush.msrb.mxu3 %v1204_v32  ;;  %v235_v32 = vpop.xlane.xlu0 %234 }
 0x1d5   :  { %741 = vmatpush.msrb.mxu2 %v694_v29  ;;  %v236_v33 = vsub.f32 %v1292_v44, %v235_v32 }
 0x1d7   :  { %v237_v38 = vmul.f32 1.442695, %v236_v33 }
 0x229   :  { %v1349_v4 = vpop.xlane.xlu1 %323 }
 0x238   :  { %v387_v53 = vpop.f32.mrf.mxu2  ;;  %v407_v54 = vpop.f32.mrf.mxu3 }
 0x239   :  { %v410_v55 = vadd.f32 %v387_v53, %v336_v51  ;;  %v411_v56 = vadd.f32 %v407_v54, %v337_v52 }
 0x23b   :  { %412 = vmax.xlane.f32.xlu1 %v411_v56  ;;  %475 = vmatmul.f32.vlgmr.msra.gmra.mxu0 %v410_v55 }
 0x23c   :  { %495 = vmatmul.f32.vlgmr.msra.gmra.mxu1 %v410_v55 }
 0x2ae   :  { %v413_v15 = vpop.xlane.xlu1 %412 }
 0x2af   :  { %v414_v20 = vsub.f32 %v411_v56, %v413_v15 }
 0x2b1   :  { %v415_v22 = vmul.f32 1.442695, %v414_v20 }
 0x2b3   :  { %828 = vpow2.f32 %v415_v22 }
 0x2b8   :  { %v476_v59 = vpop.f32.mrf.mxu0 }
 0x2b9   :  { %v499_v60 = vadd.f32 %v476_v59, %v425_v57  ;;  %v496_v61 = vpop.f32.mrf.mxu1  ;;  %v829_v23 = vpop.eup %828  ;;  %v325_v59 = vsub.f32 %v1327_v50, %v1349_v4 }
 0x2ba   :  { %v1346_v62 = vadd.f32 %v496_v61, %v426_v58  ;;  %v693_v61 = vld [vmem:[#allocation2 + $0x78] sm:$0xff] }
 0x2bb   :  { %564 = vmatmul.f32.vlgmr.msra.gmra.mxu2 %v499_v60  ;;  %584 = vmatmul.f32.vlgmr.msra.gmra.mxu3 %v499_v60  ;;  %v692_v60 = vld [vmem:[#allocation2 + $0x70] sm:$0xff]  ;;  %v326_v63 = vmul.f32 1.442695, %v325_v59 }
 0x2bc   :  { %501 = vmax.xlane.f32.xlu2 %v1346_v62 }
 0x32f   :  { %v502_v30 = vpop.xlane.xlu2 %501 }
 0x330   :  { %v503_v43 = vsub.f32 %v1346_v62, %v502_v30 }
 0x332   :  { %v504_v47 = vmul.f32 1.442695, %v503_v43 }
 0x33e   :  { %v565_v13 = vpop.f32.mrf.mxu2  ;;  %v585_v14 = vpop.f32.mrf.mxu3 }
 0x33f   :  { %v588_v16 = vadd.f32 %v565_v13, %v514_v10  ;;  %v1355_v17 = vadd.f32 %v585_v14, %v515_v11 }
 0x341   :  { %590 = vmax.xlane.f32.xlu2 %v1355_v17  ;;  %653 = vmatmul.f32.vlgmr.msrb.gmra.mxu0 %v588_v16 }
 0x342   :  { %673 = vmatmul.f32.vlgmr.msrb.gmra.mxu1 %v588_v16 }
 0x349   :  { %151 = vadd.xlane.f32.xlu2 %v827_v21 }
 0x351   :  { %417 = vadd.xlane.f32.xlu2 %v829_v23 }
 0x3b4   :  { %v591_v31 = vpop.xlane.xlu2 %590 }
 0x3b5   :  { %v592_v8 = vsub.f32 %v1355_v17, %v591_v31 }
 0x3b7   :  { %v593_v4 = vmul.f32 1.442695, %v592_v8 }
 0x3bc   :  { %v152_v34 = vpop.xlane.xlu2 %151 }
 0x3bd   :  { %830 = vlog2.f32 %v152_v34 }
 0x3be   :  { %v654_v37 = vpop.f32.mrf.mxu0  ;;  %832 = vpow2.f32 %v237_v38 }
 0x3bf   :  { %v677_v39 = vadd.f32 %v654_v37, %v603_v35  ;;  %v674_v40 = vpop.f32.mrf.mxu1 }
 0x3c0   :  { %v678_v41 = vadd.f32 %v674_v40, %v604_v36 }
 0x3c1   :  { %742 = vmatmul.f32.vlgmr.msrb.gmra.mxu2 %v677_v39  ;;  %762 = vmatmul.f32.vlgmr.msrb.gmra.mxu3 %v677_v39 }
 0x3c2   :  { %679 = vmax.xlane.f32.xlu0 %v678_v41 }
 0x3c3   :  { %v831_v42 = vpop.eup %830 }
 0x3c4   :  { %v154_v45 = vmul.f32 0.6931472, %v831_v42  ;;  %v418_v46 = vpop.xlane.xlu2 %417  ;;  %v833_v48 = vpop.eup %832 }
 0x3c5   :  { %834 = vlog2.f32 %v418_v46 }
 0x3c6   :  { %v155_v44 = vsub.f32 %v1352_v6, %v154_v45  ;;  %836 = vpow2.f32 %v504_v47 }
 0x3c8   :  { %156 = vst [vmem:[#allocation8] sm:$0xff] %v155_v44 }
 0x3ca   :  { %239 = vadd.xlane.f32.xlu0 %v833_v48 }
 0x3cb   :  { %v835_v49 = vpop.eup %834 }
 0x3cc   :  { %v420_v51 = vmul.f32 0.6931472, %v835_v49  ;;  %v837_v53 = vpop.eup %836 }
 0x3ce   :  { %v421_v52 = vsub.f32 %v414_v20, %v420_v51 }
 0x3d0   :  { %423 = vst [vmem:[#allocation8 + $0x18] sm:$0xff] %v421_v52 }
 0x3d2   :  { %506 = vadd.xlane.f32.xlu0 %v837_v53 }
 0x435   :  { %v680_v54 = vpop.xlane.xlu0 %679 }
 0x436   :  { %v681_v55 = vsub.f32 %v678_v41, %v680_v54 }
 0x438   :  { %v682_v56 = vmul.f32 1.442695, %v681_v55 }
 0x43a   :  { %838 = vpow2.f32 %v682_v56 }
 0x43d   :  { %v240_v57 = vpop.xlane.xlu0 %239 }
 0x43e   :  { %840 = vlog2.f32 %v240_v57 }
 0x440   :  { %v839_v58 = vpop.eup %838 }
 0x441   :  { %684 = vadd.xlane.f32.xlu2 %v839_v58 }
 0x444   :  { %v841_v62 = vpop.eup %840  ;;  %v743_v0 = vpop.f32.mrf.mxu2 }
 0x445   :  { %v763_v1 = vpop.f32.mrf.mxu3  ;;  %v242_v2 = vmul.f32 0.6931472, %v841_v62  ;;  %v507_v3 = vpop.xlane.xlu0 %506  ;;  %v766_v5 = vadd.f32 %v743_v0, %v692_v60 }
 0x446   :  { %v767_v6 = vadd.f32 %v763_v1, %v693_v61  ;;  %842 = vlog2.f32 %v507_v3 }
 0x447   :  { %v243_v7 = vsub.f32 %v236_v33, %v242_v2  ;;  %780 = vst [vmem:[#allocation9] sm:$0xff] %v766_v5  ;;  %844 = vpow2.f32 %v326_v63 }
 0x448   :  { %768 = vmax.xlane.f32.xlu1 %v767_v6  ;;  %846 = vpow2.f32 %v593_v4  ;;  %804 = dma.vmem_to_hbm [thread:$0]  %s800_s2, 128, %s802_s7, [#allocation10]  }
 0x449   :  { %245 = vst [vmem:[#allocation8 + $0x8] sm:$0xff] %v243_v7 }
 0x44c   :  { %v843_v50 = vpop.eup %842 }
 0x44d   :  { %v509_v9 = vmul.f32 0.6931472, %v843_v50  ;;  %v845_v10 = vpop.eup %844 }
 0x44e   :  { %v847_v12 = vpop.eup %846 }
 0x44f   :  { %v510_v11 = vsub.f32 %v503_v43, %v509_v9 }
 0x450   :  { %328 = vadd.xlane.f32.xlu1 %v845_v10 }
 0x451   :  { %512 = vst [vmem:[#allocation8 + $0x20] sm:$0xff] %v510_v11 }
 0x458   :  { %595 = vadd.xlane.f32.xlu1 %v847_v12 }
 0x4b4   :  { %v685_v13 = vpop.xlane.xlu2 %684 }
 0x4b5   :  { %848 = vlog2.f32 %v685_v13 }
 0x4bb   :  { %v769_v14 = vpop.xlane.xlu1 %768  ;;  %v849_v15 = vpop.eup %848 }
 0x4bc   :  { %v770_v16 = vsub.f32 %v767_v6, %v769_v14  ;;  %v687_v18 = vmul.f32 0.6931472, %v849_v15 }
 0x4be   :  { %v771_v19 = vmul.f32 1.442695, %v770_v16  ;;  %v688_v20 = vsub.f32 %v681_v55, %v687_v18 }
 0x4c0   :  { %850 = vpow2.f32 %v771_v19  ;;  %690 = vst [vmem:[#allocation8 + $0x30] sm:$0xff] %v688_v20 }
 0x4c3   :  { %v329_v17 = vpop.xlane.xlu1 %328 }
 0x4c4   :  { %852 = vlog2.f32 %v329_v17 }
 0x4c6   :  { %v851_v21 = vpop.eup %850 }
 0x4c7   :  { %773 = vadd.xlane.f32.xlu0 %v851_v21 }
 0x4ca   :  { %v853_v22 = vpop.eup %852 }
 0x4cb   :  { %v331_v23 = vmul.f32 0.6931472, %v853_v22  ;;  %v596_v24 = vpop.xlane.xlu1 %595 }
 0x4cc   :  { %854 = vlog2.f32 %v596_v24 }
 0x4cd   :  { %v332_v25 = vsub.f32 %v325_v59, %v331_v23 }
 0x4cf   :  { %334 = vst [vmem:[#allocation8 + $0x10] sm:$0xff] %v332_v25 }
 0x4d2   :  { %v855_v26 = vpop.eup %854 }
 0x4d3   :  { %v598_v27 = vmul.f32 0.6931472, %v855_v26 }
 0x4d5   :  { %v599_v28 = vsub.f32 %v592_v8, %v598_v27 }
 0x4d7   :  { %601 = vst [vmem:[#allocation8 + $0x28] sm:$0xff] %v599_v28 }
 0x53a   :  { %v774_v29 = vpop.xlane.xlu0 %773 }
 0x53b   :  { %856 = vlog2.f32 %v774_v29 }
 0x541   :  { %v857_v30 = vpop.eup %856 }
 0x542   :  { %v776_v31 = vmul.f32 0.6931472, %v857_v30 }
 0x544   :  { %v777_v32 = vsub.f32 %v770_v16, %v776_v31 }
 0x546   :  { %779 = vst [vmem:[#allocation8 + $0x38] sm:$0xff] %v777_v32 }
 0x547   :  { %793 = dma.vmem_to_hbm [thread:$0]  %s786_s9, 1024, %s788_s4, [#allocation4], %s993_s12, %s993_s12, %s994_s13  }
 0x548   :  { %982 = dma.done.wait [#allocation4], 1024  }
 0x549   :  { %983 = vsyncadd [#allocation4], 4294966272 }
 0x54a   :  { %984 = dma.done.wait [#allocation10], 128  }
 0x54b   :  { %985 = vsyncadd [#allocation10], 4294967168 }
 0x54c   :  { %813 = vsyncpa [#allocation3], 1 }
 0x54d   :  { %814 = vsyncpa [#allocation6], 1 }
 0x54e   :  { %815 = vsyncpa [#allocation4], 1 }
 0x54f   :  { %816 = vsyncpa [#allocation10], 1 }

</bundles_post_ra>
